<compile_context>
chip_gen: v5e
topology: v5e:2x2
jax: 0.10.0
libtpu: 0.0.40
codegen_flags: <defaults>
</compile_context>

<pallas_src>
import functools
import numpy as np
import jax
import jax.numpy as jnp
from jax import lax
from jax.experimental import pallas as pl
from jax.experimental.pallas import tpu as pltpu


def _se_kernel(params_ref, a_ref, b_ref, a2_ref, b2_ref, out_ref, *, sym):
    # params (SMEM, float32): [var, -0.5*gamma^2, jitter]
    var = params_ref[0]
    neg_half_gamma2 = params_ref[1]
    jitter = params_ref[2]

    a = a_ref[...]          # (tn, D) f32
    b = b_ref[...]          # (tm, D) f32
    a2 = a2_ref[...]        # (tn, 1) f32, precomputed ||a_i||^2
    b2 = b2_ref[...]        # (1, tm) f32, precomputed ||b_j||^2

    # Cross term on the MXU via an NT dot_general (no explicit transpose).
    ab = lax.dot_general(a, b,
                         dimension_numbers=(((1,), (1,)), ((), ())),
                         preferred_element_type=jnp.float32,
                         precision=lax.Precision.HIGHEST)        # (tn, tm)
    d2 = jnp.maximum(a2 - 2.0 * ab + b2, 0.0)
    cov = var * jnp.exp(neg_half_gamma2 * d2)

    if sym:
        i = pl.program_id(0)
        j = pl.program_id(1)
        tn, tm = cov.shape
        row0 = i * tn
        col0 = j * tm
        # Only tiles intersecting the global diagonal need the jitter add.
        intersects = jnp.logical_and(row0 < col0 + tm, col0 < row0 + tn)

        @pl.when(intersects)
        def _():
            row = lax.broadcasted_iota(jnp.int32, (tn, tm), 0) + row0
            col = lax.broadcasted_iota(jnp.int32, (tn, tm), 1) + col0
            diag = jnp.where(row == col, jitter, jnp.float32(0.0))
            out_ref[...] = (cov + diag).astype(out_ref.dtype)

        @pl.when(jnp.logical_not(intersects))
        def _():
            out_ref[...] = cov.astype(out_ref.dtype)
    else:
        out_ref[...] = cov.astype(out_ref.dtype)


def _round_up(x, m):
    return ((x + m - 1) // m) * m


def squared_exponential(a, b=None, *, logvar, loggamma, jitter=1e-6,
                        tile_n=512, tile_m=512):
    """Pallas equivalent of SquaredExponential.forward(a, b)."""
    sym = b is None
    if sym:
        b = a
    N, D = a.shape
    M, Db = b.shape
    assert D == Db

    # Shrink tiles for small problems (tn multiple of 8, tm multiple of 128
    # for lane-dense output stores).  Only the *inputs* are padded (cheap,
    # O((N+M)*D)); the output is exactly (N, M) and boundary tiles use masked
    # stores, so there is no full-matrix pad+slice round trip through HBM.
    tn = min(tile_n, _round_up(N, 8))
    tm = min(tile_m, _round_up(M, 128))
    Np = _round_up(N, tn)
    Mp = _round_up(M, tm)

    a_p = a.astype(jnp.float32)
    b_p = b.astype(jnp.float32)
    if Np != N:
        a_p = jnp.pad(a_p, ((0, Np - N), (0, 0)))
    if Mp != M:
        b_p = jnp.pad(b_p, ((0, Mp - M), (0, 0)))

    # Row norms hoisted out of the kernel (O(N+M) work done once in XLA).
    a2 = jnp.sum(a_p * a_p, axis=-1, keepdims=True)        # (Np, 1)
    b2 = jnp.sum(b_p * b_p, axis=-1)[None, :]               # (1, Mp)

    var = jnp.exp(logvar).astype(jnp.float32)
    gamma = jnp.exp(loggamma).astype(jnp.float32)
    params = jnp.stack([var, -0.5 * gamma * gamma, jnp.float32(jitter)])

    grid_n = Np // tn
    grid_m = Mp // tm

    # `a` block index is constant along the inner (j) axis -> DMA'd once per i.
    cost = pl.CostEstimate(
        flops=2 * N * M * D + 6 * N * M,
        transcendentals=N * M,
        bytes_accessed=4 * (Np * D + Mp * D * grid_n + N * M),
    )

    out = pl.pallas_call(
        functools.partial(_se_kernel, sym=sym),
        out_shape=jax.ShapeDtypeStruct((N, M), jnp.float32),
        grid=(grid_n, grid_m),
        in_specs=[
            pl.BlockSpec(memory_space=pltpu.MemorySpace.SMEM),      # params
            pl.BlockSpec((tn, D), lambda i, j: (i, 0)),             # a row tile
            pl.BlockSpec((tm, D), lambda i, j: (j, 0)),             # b col tile
            pl.BlockSpec((tn, 1), lambda i, j: (i, 0)),             # ||a||^2
            pl.BlockSpec((1, tm), lambda i, j: (0, j)),             # ||b||^2
        ],
        out_specs=pl.BlockSpec((tn, tm), lambda i, j: (i, j)),
        compiler_params=pltpu.CompilerParams(
            dimension_semantics=("parallel", "parallel"),
            # Big tiles need more than v5e's 16 MiB / v6e's 32 MiB scoped
            # default; 48 MiB stays under v7x's 64 MiB physical VMEM.
            vmem_limit_bytes=48 * 1024 * 1024,
        ),
        cost_estimate=cost,
    )(params, a_p, b_p, a2, b2)

    return out


def _reference(a, b, logvar, loggamma, jitter, sym):
    gamma = jnp.exp(loggamma)
    var = jnp.exp(logvar)
    aa = a * gamma
    bb = b * gamma
    cross = jnp.matmul(aa, bb.T, precision=lax.Precision.HIGHEST)
    d2 = jnp.maximum(
        jnp.sum(aa * aa, -1, keepdims=True)
        - 2.0 * cross
        + jnp.sum(bb * bb, -1, keepdims=True).T,
        0.0,
    )
    cov = var * jnp.exp(-0.5 * d2)
    if sym:
        cov = cov + jnp.eye(a.shape[0], dtype=cov.dtype) * jitter
    return cov


if __name__ == "__main__":
    # deterministic parameter init (mirrors __init__(var, scale, jitter)):
    var_init = 1.5
    scale_init = 0.7
    jitter = 1e-6
    logvar = jnp.float32(np.log(var_init))
    loggamma = jnp.float32(-np.log(scale_init))

    key = jax.random.PRNGKey(0)
    ka, kb = jax.random.split(key)
    N, M, D = 16, 16, 32
    a = jax.random.normal(ka, (N, D), dtype=jnp.float32)
    b = jax.random.normal(kb, (M, D), dtype=jnp.float32)

    # symmetric call: cov(a) with jitter on the diagonal
    cov_sym = squared_exponential(a, None, logvar=logvar, loggamma=loggamma,
                                  jitter=jitter)
    jax.block_until_ready(cov_sym)
    ref_sym = _reference(a, a, logvar, loggamma, jitter, sym=True)

    # cross call: cov(a, b), no jitter
    cov_ab = squared_exponential(a, b, logvar=logvar, loggamma=loggamma,
                                 jitter=jitter)
    jax.block_until_ready(cov_ab)
    ref_ab = _reference(a, b, logvar, loggamma, jitter, sym=False)

    assert cov_sym.shape == (N, N) and cov_ab.shape == (N, M)
    np.testing.assert_allclose(np.asarray(cov_sym), np.asarray(ref_sym),
                               rtol=1e-5, atol=1e-5)
    np.testing.assert_allclose(np.asarray(cov_ab), np.asarray(ref_ab),
                               rtol=1e-5, atol=1e-5)
    print("KERNEL_OK")
</pallas_src>

<mosaic_0001>
module attributes {stable_mosaic.version = 11 : i64} {
  func.func @_se_kernel(%arg0: i32, %arg1: i32, %arg2: memref<3xf32, #tpu.memory_space<smem>>, %arg3: memref<16x32xf32, #tpu.memory_space<vmem>>, %arg4: memref<128x32xf32, #tpu.memory_space<vmem>>, %arg5: memref<16x1xf32, #tpu.memory_space<vmem>>, %arg6: memref<1x128xf32, #tpu.memory_space<vmem>>, %arg7: memref<16x128xf32, #tpu.memory_space<vmem>>) attributes {dimension_semantics = [#tpu.dimension_semantics<parallel>, #tpu.dimension_semantics<parallel>], iteration_bounds = array<i64: 1, 1>, scalar_prefetch = 0 : i64, scratch_operands = 0 : i64, tpu.core_type = #tpu.core_type<tc>, window_params = [{transform_indices = @transform_0, window_bounds = array<i64: 3>}, {transform_indices = @transform_1, window_bounds = array<i64: 16, 32>}, {transform_indices = @transform_2, window_bounds = array<i64: 128, 32>}, {transform_indices = @transform_3, window_bounds = array<i64: 16, 1>}, {transform_indices = @transform_4, window_bounds = array<i64: 1, 128>}, {transform_indices = @transform_5, window_bounds = array<i64: 16, 128>}]} {
    %c0 = arith.constant 0 : index
    %0 = memref.load %arg2[%c0] : memref<3xf32, #tpu.memory_space<smem>>
    %c1 = arith.constant 1 : index
    %1 = memref.load %arg2[%c1] : memref<3xf32, #tpu.memory_space<smem>>
    %c2 = arith.constant 2 : index
    %2 = memref.load %arg2[%c2] : memref<3xf32, #tpu.memory_space<smem>>
    %c0_0 = arith.constant 0 : index
    %c0_1 = arith.constant 0 : index
    %3 = vector.load %arg3[%c0_0, %c0_1] : memref<16x32xf32, #tpu.memory_space<vmem>>, vector<16x32xf32>
    %c0_2 = arith.constant 0 : index
    %c0_3 = arith.constant 0 : index
    %4 = vector.load %arg4[%c0_2, %c0_3] : memref<128x32xf32, #tpu.memory_space<vmem>>, vector<128x32xf32>
    %c0_4 = arith.constant 0 : index
    %c0_5 = arith.constant 0 : index
    %5 = vector.load %arg5[%c0_4, %c0_5] : memref<16x1xf32, #tpu.memory_space<vmem>>, vector<16x1xf32>
    %c0_6 = arith.constant 0 : index
    %c0_7 = arith.constant 0 : index
    %6 = vector.load %arg6[%c0_6, %c0_7] : memref<1x128xf32, #tpu.memory_space<vmem>>, vector<1x128xf32>
    %cst = arith.constant dense<0.000000e+00> : vector<16x128xf32>
    %7 = tpu.matmul %3, %4, %cst {dimension_numbers = #tpu.dot_dimension_numbers<[1], [1], [0], [0], [0, 0, 1, 0], [], []>, precision = #tpu.contract_precision<fp32>} : vector<16x32xf32>, vector<128x32xf32>, vector<16x128xf32> -> vector<16x128xf32>
    %cst_8 = arith.constant 2.000000e+00 : f32
    %8 = vector.broadcast %cst_8 : f32 to vector<16x128xf32>
    %9 = arith.mulf %8, %7 : vector<16x128xf32>
    %10 = vector.broadcast %5 : vector<16x1xf32> to vector<16x128xf32>
    %11 = arith.subf %10, %9 : vector<16x128xf32>
    %12 = vector.broadcast %6 : vector<1x128xf32> to vector<16x128xf32>
    %13 = arith.addf %11, %12 : vector<16x128xf32>
    %cst_9 = arith.constant 0.000000e+00 : f32
    %14 = vector.broadcast %cst_9 : f32 to vector<16x128xf32>
    %15 = arith.maximumf %13, %14 : vector<16x128xf32>
    %16 = vector.broadcast %1 : f32 to vector<16x128xf32>
    %17 = arith.mulf %16, %15 : vector<16x128xf32>
    %18 = math.exp %17 : vector<16x128xf32>
    %19 = vector.broadcast %0 : f32 to vector<16x128xf32>
    %20 = arith.mulf %19, %18 : vector<16x128xf32>
    %c16_i32 = arith.constant 16 : i32
    %21 = arith.muli %arg0, %c16_i32 : i32
    %c128_i32 = arith.constant 128 : i32
    %22 = arith.muli %arg1, %c128_i32 : i32
    %c128_i32_10 = arith.constant 128 : i32
    %23 = arith.addi %22, %c128_i32_10 : i32
    %24 = arith.cmpi slt, %21, %23 : i32
    %c16_i32_11 = arith.constant 16 : i32
    %25 = arith.addi %21, %c16_i32_11 : i32
    %26 = arith.cmpi slt, %22, %25 : i32
    %27 = arith.andi %24, %26 : i1
    %28 = arith.extui %27 : i1 to i32
    %c0_i32 = arith.constant 0 : i32
    %29 = arith.cmpi ne, %28, %c0_i32 : i32
    scf.if %29 {
      %33 = tpu.iota {dimensions = array<i32: 0>} : vector<16x128xi32>
      %34 = vector.broadcast %21 : i32 to vector<16x128xi32>
      %35 = arith.addi %33, %34 : vector<16x128xi32>
      %36 = tpu.iota {dimensions = array<i32: 1>} : vector<16x128xi32>
      %37 = vector.broadcast %22 : i32 to vector<16x128xi32>
      %38 = arith.addi %36, %37 : vector<16x128xi32>
      %39 = arith.cmpi eq, %35, %38 : vector<16x128xi32>
      %cst_13 = arith.constant 0.000000e+00 : f32
      %40 = vector.broadcast %2 : f32 to vector<16x128xf32>
      %41 = vector.broadcast %cst_13 : f32 to vector<16x128xf32>
      %42 = arith.select %39, %40, %41 : vector<16x128xi1>, vector<16x128xf32>
      %43 = arith.addf %20, %42 : vector<16x128xf32>
      %c0_14 = arith.constant 0 : index
      %c0_15 = arith.constant 0 : index
      %44 = vector.load %arg7[%c0_14, %c0_15] : memref<16x128xf32, #tpu.memory_space<vmem>>, vector<16x128xf32>
      tpu.vector_store %arg7[%c0_14, %c0_15], %43 {strides = array<i32>} : memref<16x128xf32, #tpu.memory_space<vmem>>, vector<16x128xf32>,
    } else {
    }
    %true = arith.constant true
    %30 = arith.xori %27, %true : i1
    %31 = arith.extui %30 : i1 to i32
    %c0_i32_12 = arith.constant 0 : i32
    %32 = arith.cmpi ne, %31, %c0_i32_12 : i32
    scf.if %32 {
      %c0_13 = arith.constant 0 : index
      %c0_14 = arith.constant 0 : index
      %33 = vector.load %arg7[%c0_13, %c0_14] : memref<16x128xf32, #tpu.memory_space<vmem>>, vector<16x128xf32>
      tpu.vector_store %arg7[%c0_13, %c0_14], %20 {strides = array<i32>} : memref<16x128xf32, #tpu.memory_space<vmem>>, vector<16x128xf32>,
    } else {
    }
    return
  }
  func.func @transform_0(%arg0: i32, %arg1: i32) -> i32 {
    %c0_i32 = arith.constant 0 : i32
    %c0_i32_0 = arith.constant 0 : i32
    return %c0_i32 : i32
  }
  func.func @transform_1(%arg0: i32, %arg1: i32) -> (i32, i32) {
    %c0_i32 = arith.constant 0 : i32
    %c0_i32_0 = arith.constant 0 : i32
    return %arg0, %c0_i32 : i32, i32
  }
  func.func @transform_2(%arg0: i32, %arg1: i32) -> (i32, i32) {
    %c0_i32 = arith.constant 0 : i32
    %c0_i32_0 = arith.constant 0 : i32
    return %arg1, %c0_i32 : i32, i32
  }
  func.func @transform_3(%arg0: i32, %arg1: i32) -> (i32, i32) {
    %c0_i32 = arith.constant 0 : i32
    %c0_i32_0 = arith.constant 0 : i32
    return %arg0, %c0_i32 : i32, i32
  }
  func.func @transform_4(%arg0: i32, %arg1: i32) -> (i32, i32) {
    %c0_i32 = arith.constant 0 : i32
    %c0_i32_0 = arith.constant 0 : i32
    return %c0_i32, %arg1 : i32, i32
  }
  func.func @transform_5(%arg0: i32, %arg1: i32) -> (i32, i32) {
    %c0_i32 = arith.constant 0 : i32
    return %arg0, %arg1 : i32, i32
  }
}

</mosaic_0001>

<bundles_post_ra>
// kernel: tpu_custom_call.1
= control target key start
LH: loop header
LB: loop body
LE: loop exit
PB: predicated region body
PF: predicated region fallthrough
CT: control target
= control target key end

     0   :  { %10 = vsyncpa [#allocation4], 0  ;;  %s980_s0 = inlined_call_operand.vmem [shape: f32[3], index: 0, kind: input, shape index: {}]   ;;  %s981_s1 = inlined_call_operand.vmem [shape: f32[16,32], index: 1, kind: input, shape index: {}]   ;;  %s982_s2 = inlined_call_operand.vmem [shape: f32[128,32], index: 2, kind: input, shape index: {}]   ;;  %s983_s3 = inlined_call_operand.vmem [shape: f32[16,1], index: 3, kind: input, shape index: {}]   ;;  %s984_s4 = inlined_call_operand.vmem [shape: f32[1,128], index: 4, kind: input, shape index: {}]   ;;  %s985_s5 = inlined_call_operand.hbm [shape: f32[16,16], index: 5, kind: output, shape index: {}]  }
   0x1   :  { %11 = vsyncpa [#allocation3], 0  ;;  %s17_s20 = sshll.u32 %s980_s0, 4  ;;  %s654_s21 = smov [#allocation2]   ;;  %s18_s20 = int_to_ptr.vmem [resolvable:$true] %s17_s20 }
   0x2   :  { %20 = dma.vmem_to_smem %s18_s20, 16, %s654_s21, [#allocation4]  }
   0x3   :  { %650 = dma.done.wait [#allocation4], 16  }
   0x4   :  { %651 = vsyncadd [#allocation4], 4294967280 }
   0x5   :  { %33 = sfence }
   0x6   :  { %v54_v0 = vld [vmem:[%s982_s2 + $0x78] sm:$0xff]  ;;  %vm58_vm0 = vcmask 261120   ;;  %v53_v1 = vld [vmem:[%s982_s2 + $0x70] sm:$0xff]  ;;  %v52_v2 = vld [vmem:[%s982_s2 + $0x68] sm:$0xff]  ;;  %s570_s10 = sld [smem:[#allocation2 + $0x2]]  ;;  %s556_s15 = sshll.u32 %s985_s5, 4  ;;  %s557_s15 = int_to_ptr.hbm [resolvable:$true] %s556_s15 }
   0x7   :  { %v111_v3 = vsel %vm58_vm0, %v54_v0, 0  ;;  %v108_v4 = vsel %vm58_vm0, %v53_v1, 0  ;;  %v105_v5 = vsel %vm58_vm0, %v52_v2, 0  ;;  %v51_v6 = vld [vmem:[%s982_s2 + $0x60] sm:$0xff]  ;;  %v50_v7 = vld [vmem:[%s982_s2 + $0x58] sm:$0xff]  ;;  %v49_v17 = vld [vmem:[%s982_s2 + $0x50] sm:$0xff] }
   0x8   :  { %v710_v8 = vand.u32 4294901760, %v111_v3  ;;  %v712_v9 = vand.u32 4294901760, %v108_v4  ;;  %v714_v10 = vand.u32 4294901760, %v105_v5  ;;  %v102_v11 = vsel %vm58_vm0, %v51_v6, 0  ;;  %v48_v26 = vld [vmem:[%s982_s2 + $0x48] sm:$0xff]  ;;  %v47_v34 = vld [vmem:[%s982_s2 + $0x40] sm:$0xff] }
   0x9   :  { %v717_v12 = vand.u32 4294901760, %v102_v11  ;;  %v99_v16 = vsel %vm58_vm0, %v50_v7, 0  ;;  %v96_v21 = vsel %vm58_vm0, %v49_v17, 0  ;;  %v93_v29 = vsel %vm58_vm0, %v48_v26, 0  ;;  %v46_v41 = vld [vmem:[%s982_s2 + $0x38] sm:$0xff]  ;;  %v45_v48 = vld [vmem:[%s982_s2 + $0x30] sm:$0xff] }
   0xa   :  { %114 = vmatpush.xpose.msra.mxu0 %v710_v8  ;;  %v163_v13 = vsub.f32 %v111_v3, %v710_v8  ;;  %327 = vmatpush.xpose.msra.mxu3 %v710_v8  ;;  %v169_v14 = vsub.f32 %v108_v4, %v712_v9  ;;  %v175_v15 = vsub.f32 %v105_v5, %v714_v10  ;;  %v732_v20 = vand.u32 4294901760, %v99_v16  ;;  %v44_v54 = vld [vmem:[%s982_s2 + $0x28] sm:$0xff]  ;;  %v43_v62 = vld [vmem:[%s982_s2 + $0x20] sm:$0xff]  ;;  %v42_v5 = vld [vmem:[%s982_s2 + $0x18] sm:$0xff]  ;;  %s34_s11 = sld [smem:[#allocation2]]  ;;  %s657_s16 = smov 128  }
   0xb   :  { %v181_v24 = vsub.f32 %v102_v11, %v717_v12  ;;  %v745_v28 = vand.u32 4294901760, %v96_v21  ;;  %v757_v35 = vand.u32 4294901760, %v93_v29  ;;  %v90_v36 = vsel %vm58_vm0, %v47_v34, 0  ;;  %s658_s17 = smov 8  }
   0xc   :  { %269 = vmatpush.xpose.msra.mxu2 %v163_v13  ;;  %v728_v18 = vand.u32 4294901760, %v163_v13  ;;  %v730_v19 = vand.u32 4294901760, %v169_v14  ;;  %v740_v25 = vand.u32 4294901760, %v175_v15  ;;  %v187_v32 = vsub.f32 %v99_v16, %v732_v20  ;;  %v41_v16 = vld [vmem:[%s982_s2 + $0x10] sm:$0xff] }
   0xd   :  { %v751_v33 = vand.u32 4294901760, %v181_v24  ;;  %v193_v39 = vsub.f32 %v96_v21, %v745_v28  ;;  %v769_v42 = vand.u32 4294901760, %v90_v36  ;;  %v199_v45 = vsub.f32 %v93_v29, %v757_v35 }
   0xe   :  { %116 = vmatpush.xpose.msra.mxu0 %v712_v9  ;;  %v165_v22 = vsub.f32 %v163_v13, %v728_v18  ;;  %329 = vmatpush.xpose.msra.mxu3 %v712_v9  ;;  %v171_v23 = vsub.f32 %v169_v14, %v730_v19  ;;  %v177_v31 = vsub.f32 %v175_v15, %v740_v25  ;;  %v763_v40 = vand.u32 4294901760, %v187_v32 }
   0xf   :  { %v183_v38 = vsub.f32 %v181_v24, %v751_v33  ;;  %v774_v46 = vand.u32 4294901760, %v193_v39  ;;  %v87_v47 = vsel %vm58_vm0, %v46_v41, 0  ;;  %v205_v49 = vsub.f32 %v90_v36, %v769_v42 }
  0x10   :  { %272 = vmatpush.xpose.msra.mxu2 %v169_v14  ;;  %v166_v27 = vand.u32 4294901760, %v165_v22  ;;  %v172_v30 = vand.u32 4294901760, %v171_v23  ;;  %v178_v37 = vand.u32 4294901760, %v177_v31  ;;  %v189_v44 = vsub.f32 %v187_v32, %v763_v40 }
  0x11   :  { %v184_v43 = vand.u32 4294901760, %v183_v38  ;;  %v195_v51 = vsub.f32 %v193_v39, %v774_v46  ;;  %v784_v52 = vand.u32 4294901760, %v87_v47  ;;  %v786_v53 = vand.u32 4294901760, %v199_v45 }
  0x12   :  { %118 = vmatpush.xpose.msra.mxu0 %v714_v10  ;;  %167 = vmatpush.xpose.msra.mxu1 %v166_v27  ;;  %v190_v50 = vand.u32 4294901760, %v189_v44  ;;  %v84_v55 = vsel %vm58_vm0, %v45_v48, 0  ;;  %v793_v56 = vand.u32 4294901760, %v205_v49  ;;  %v81_v57 = vsel %vm58_vm0, %v44_v54, 0  ;;  %v40_v27 = vld [vmem:[%s982_s2 + $0x8] sm:$0xff] }
  0x13   :  { %331 = vmatpush.xpose.msra.mxu3 %v714_v10  ;;  %v196_v58 = vand.u32 4294901760, %v195_v51  ;;  %v201_v59 = vsub.f32 %v199_v45, %v786_v53  ;;  %v211_v60 = vsub.f32 %v87_v47, %v784_v52  ;;  %v799_v61 = vand.u32 4294901760, %v84_v55 }
  0x14   :  { %275 = vmatpush.xpose.msra.mxu2 %v175_v15  ;;  %v207_v63 = vsub.f32 %v205_v49, %v793_v56  ;;  %v806_v0 = vand.u32 4294901760, %v81_v57  ;;  %v78_v4 = vsel %vm58_vm0, %v43_v62, 0  ;;  %v75_v15 = vsel %vm58_vm0, %v42_v5, 0 }
  0x15   :  { %v202_v1 = vand.u32 4294901760, %v201_v59  ;;  %v217_v2 = vsub.f32 %v84_v55, %v799_v61  ;;  %v810_v3 = vand.u32 4294901760, %v211_v60  ;;  %v817_v6 = vand.u32 4294901760, %v78_v4 }
  0x16   :  { %120 = vmatpush.xpose.msra.mxu0 %v717_v12  ;;  %173 = vmatpush.xpose.msra.mxu1 %v172_v30  ;;  %v208_v7 = vand.u32 4294901760, %v207_v63  ;;  %v223_v13 = vsub.f32 %v81_v57, %v806_v0  ;;  %v832_v23 = vand.u32 4294901760, %v75_v15  ;;  %v72_v26 = vsel %vm58_vm0, %v41_v16, 0 }
  0x17   :  { %333 = vmatpush.xpose.msra.mxu3 %v717_v12  ;;  %v213_v11 = vsub.f32 %v211_v60, %v810_v3  ;;  %v822_v14 = vand.u32 4294901760, %v217_v2  ;;  %v229_v17 = vsub.f32 %v78_v4, %v817_v6  ;;  %v846_v34 = vand.u32 4294901760, %v72_v26  ;;  %v37_v4 = vld [vmem:[%s981_s1] sm:$0xff] }
  0x18   :  { %278 = vmatpush.xpose.msra.mxu2 %v181_v24  ;;  %v834_v24 = vand.u32 4294901760, %v223_v13  ;;  %v69_v36 = vsel %vm58_vm0, %v40_v27, 0  ;;  %v60_v5 = vsel %vm58_vm0, %v37_v4, 0 }
  0x19   :  { %v214_v21 = vand.u32 4294901760, %v213_v11  ;;  %v219_v22 = vsub.f32 %v217_v2, %v822_v14  ;;  %v841_v29 = vand.u32 4294901760, %v229_v17  ;;  %v241_v41 = vsub.f32 %v72_v26, %v846_v34 }
  0x1a   :  { %122 = vmatpush.xpose.msra.mxu0 %v732_v20  ;;  %179 = vmatpush.xpose.msra.mxu1 %v178_v37  ;;  %v225_v31 = vsub.f32 %v223_v13, %v834_v24  ;;  %v39_v37 = vld [vmem:[%s982_s2] sm:$0xff] }
  0x1b   :  { %335 = vmatpush.xpose.msra.mxu3 %v732_v20  ;;  %v220_v30 = vand.u32 4294901760, %v219_v22  ;;  %v231_v38 = vsub.f32 %v229_v17, %v841_v29  ;;  %v867_v51 = vand.u32 4294901760, %v241_v41 }
  0x1c   :  { %281 = vmatpush.xpose.msra.mxu2 %v187_v32  ;;  %v235_v32 = vsub.f32 %v75_v15, %v832_v23 }
  0x1d   :  { %v232_v47 = vand.u32 4294901760, %v231_v38  ;;  %v243_v55 = vsub.f32 %v241_v41, %v867_v51 }
  0x1e   :  { %124 = vmatpush.xpose.msra.mxu0 %v745_v28  ;;  %185 = vmatpush.xpose.msra.mxu1 %v184_v43  ;;  %v856_v43 = vand.u32 4294901760, %v69_v36  ;;  %v858_v44 = vand.u32 4294901760, %v235_v32 }
  0x1f   :  { %337 = vmatpush.xpose.msra.mxu3 %v745_v28  ;;  %v244_v59 = vand.u32 4294901760, %v243_v55 }
  0x20   :  { %284 = vmatpush.xpose.msra.mxu2 %v193_v39  ;;  %v226_v39 = vand.u32 4294901760, %v225_v31  ;;  %v237_v48 = vsub.f32 %v235_v32, %v858_v44 }
  0x22   :  { %126 = vmatpush.xpose.msra.mxu0 %v757_v35  ;;  %191 = vmatpush.xpose.msra.mxu1 %v190_v50  ;;  %v238_v54 = vand.u32 4294901760, %v237_v48 }
  0x23   :  { %339 = vmatpush.xpose.msra.mxu3 %v757_v35 }
  0x24   :  { %287 = vmatpush.xpose.msra.mxu2 %v199_v45  ;;  %v66_v45 = vsel %vm58_vm0, %v39_v37, 0 }
  0x25   :  { %v865_v50 = vand.u32 4294901760, %v66_v45 }
  0x26   :  { %128 = vmatpush.xpose.msra.mxu0 %v769_v42  ;;  %197 = vmatpush.xpose.msra.mxu1 %v196_v58 }
  0x27   :  { %341 = vmatpush.xpose.msra.mxu3 %v769_v42  ;;  %v253_v57 = vsub.f32 %v66_v45, %v865_v50  ;;  %v526_v45 = vlaneseq }
  0x28   :  { %290 = vmatpush.xpose.msra.mxu2 %v205_v49  ;;  %v247_v49 = vsub.f32 %v69_v36, %v856_v43 }
  0x29   :  { %v878_v62 = vand.u32 4294901760, %v253_v57 }
  0x2a   :  { %130 = vmatpush.xpose.msra.mxu0 %v784_v52  ;;  %203 = vmatpush.xpose.msra.mxu1 %v202_v1  ;;  %v873_v58 = vand.u32 4294901760, %v247_v49 }
  0x2b   :  { %343 = vmatpush.xpose.msra.mxu3 %v784_v52  ;;  %v255_v1 = vsub.f32 %v253_v57, %v878_v62 }
  0x2c   :  { %293 = vmatpush.xpose.msra.mxu2 %v211_v60  ;;  %v249_v60 = vsub.f32 %v247_v49, %v873_v58 }
  0x2e   :  { %132 = vmatpush.xpose.msra.mxu0 %v799_v61  ;;  %209 = vmatpush.xpose.msra.mxu1 %v208_v7  ;;  %v250_v63 = vand.u32 4294901760, %v249_v60  ;;  %v893_v7 = vand.u32 4294901760, %v60_v5  ;;  %v538_v60 = vstv %s570_s10 }
  0x2f   :  { %345 = vmatpush.xpose.msra.mxu3 %v799_v61 }
  0x30   :  { %296 = vmatpush.xpose.msra.mxu2 %v217_v2  ;;  %v256_v2 = vand.u32 4294901760, %v255_v1  ;;  %v146_v11 = vsub.f32 %v60_v5, %v893_v7 }
  0x32   :  { %134 = vmatpush.xpose.msra.mxu0 %v806_v0  ;;  %215 = vmatpush.xpose.msra.mxu1 %v214_v21 }
  0x33   :  { %347 = vmatpush.xpose.msra.mxu3 %v806_v0 }
  0x34   :  { %299 = vmatpush.xpose.msra.mxu2 %v223_v13 }
  0x36   :  { %136 = vmatpush.xpose.msra.mxu0 %v817_v6  ;;  %221 = vmatpush.xpose.msra.mxu1 %v220_v30 }
  0x37   :  { %349 = vmatpush.xpose.msra.mxu3 %v817_v6 }
  0x38   :  { %302 = vmatpush.xpose.msra.mxu2 %v229_v17 }
  0x3a   :  { %138 = vmatpush.xpose.msra.mxu0 %v832_v23  ;;  %227 = vmatpush.xpose.msra.mxu1 %v226_v39 }
  0x3b   :  { %351 = vmatpush.xpose.msra.mxu3 %v832_v23 }
  0x3c   :  { %305 = vmatpush.xpose.msra.mxu2 %v235_v32 }
  0x3e   :  { %140 = vmatpush.xpose.msra.mxu0 %v846_v34  ;;  %233 = vmatpush.xpose.msra.mxu1 %v232_v47 }
  0x3f   :  { %353 = vmatpush.xpose.msra.mxu3 %v846_v34 }
  0x40   :  { %308 = vmatpush.xpose.msra.mxu2 %v241_v41 }
  0x42   :  { %142 = vmatpush.xpose.msra.mxu0 %v856_v43  ;;  %239 = vmatpush.xpose.msra.mxu1 %v238_v54 }
  0x43   :  { %355 = vmatpush.xpose.msra.mxu3 %v856_v43 }
  0x44   :  { %311 = vmatpush.xpose.msra.mxu2 %v247_v49 }
  0x46   :  { %144 = vmatpush.xpose.msra.mxu0 %v865_v50  ;;  %245 = vmatpush.xpose.msra.mxu1 %v244_v59 }
  0x47   :  { %357 = vmatpush.xpose.msra.mxu3 %v865_v50 }
  0x48   :  { %314 = vmatpush.xpose.msra.mxu2 %v253_v57  ;;  %v533_v57 = vand.u32 127, %v526_v45 }
  0x4a   :  { %374 = vmatpush.xpose.msrb.mxu0 %v728_v18  ;;  %251 = vmatpush.xpose.msra.mxu1 %v250_v63 }
  0x4b   :  { %587 = vmatpush.xpose.msrb.mxu3 %v710_v8  ;;  %317 = vmatmul.f32.vlgmr.msra.gmra.mxu2 %v146_v11 }
  0x4c   :  { %571 = vmatpush.xpose.msrb.mxu2 %v728_v18  ;;  %v147_v18 = vand.u32 4294901760, %v146_v11 }
  0x4e   :  { %378 = vmatpush.xpose.msrb.mxu0 %v730_v19  ;;  %257 = vmatpush.xpose.msra.mxu1 %v256_v2  ;;  %v148_v13 = vsub.f32 %v146_v11, %v147_v18 }
  0x4f   :  { %588 = vmatpush.xpose.msrb.mxu3 %v712_v9 }
  0x50   :  { %572 = vmatpush.xpose.msrb.mxu2 %v730_v19  ;;  %361 = vmatmul.f32.vlgmr.msra.gmra.mxu3 %v147_v18  ;;  %v38_v19 = vld [vmem:[%s981_s1 + $0x8] sm:$0xff]  ;;  %v149_v15 = vand.u32 4294901760, %v148_v13 }
  0x51   :  { %259 = vmatmul.f32.vlgmr.msra.gmra.mxu1 %v893_v7 }
  0x52   :  { %382 = vmatpush.xpose.msrb.mxu0 %v740_v25  ;;  %445 = vmatpush.xpose.msrb.mxu1 %v710_v8  ;;  %v63_v8 = vsel %vm58_vm0, %v38_v19, 0 }
  0x53   :  { %589 = vmatpush.xpose.msrb.mxu3 %v714_v10  ;;  %v909_v16 = vand.u32 4294901760, %v63_v8  ;;  %150 = vmatmul.f32.vlgmr.msra.gmra.mxu0 %v149_v15 }
  0x54   :  { %573 = vmatpush.xpose.msrb.mxu2 %v740_v25 }
  0x55   :  { %v154_v25 = vsub.f32 %v63_v8, %v909_v16 }
  0x56   :  { %386 = vmatpush.xpose.msrb.mxu0 %v751_v33  ;;  %447 = vmatpush.xpose.msrb.mxu1 %v712_v9 }
  0x57   :  { %590 = vmatpush.xpose.msrb.mxu3 %v717_v12  ;;  %v155_v17 = vand.u32 4294901760, %v154_v25  ;;  %322 = vmatmul.f32.gmra.mxu2 %v154_v25 }
  0x58   :  { %574 = vmatpush.xpose.msrb.mxu2 %v751_v33 }
  0x59   :  { %263 = vmatmul.f32.gmra.mxu1 %v909_v16  ;;  %v156_v9 = vsub.f32 %v154_v25, %v155_v17  ;;  %367 = vmatmul.f32.gmra.mxu3 %v155_v17 }
  0x5a   :  { %390 = vmatpush.xpose.msrb.mxu0 %v763_v40  ;;  %449 = vmatpush.xpose.msrb.mxu1 %v714_v10  ;;  %v655_v10 = vmov 0  }
  0x5b   :  { %591 = vmatpush.xpose.msrb.mxu3 %v732_v20  ;;  %v157_v33 = vand.u32 4294901760, %v156_v9  ;;  %608 = vset.pattern.permute.xlu0 %v655_v10 }
  0x5c   :  { %575 = vmatpush.xpose.msrb.mxu2 %v763_v40 }
  0x5d   :  { %158 = vmatmul.f32.gmra.mxu0 %v157_v33 }
  0x5e   :  { %394 = vmatpush.xpose.msrb.mxu0 %v774_v46  ;;  %451 = vmatpush.xpose.msrb.mxu1 %v717_v12  ;;  %v55_v12 = vld [vmem:[%s983_s3] sm:$0xff] }
  0x5f   :  { %592 = vmatpush.xpose.msrb.mxu3 %v745_v28  ;;  %489 = vperm.xlu0 %608, %v55_v12  }
  0x60   :  { %576 = vmatpush.xpose.msrb.mxu2 %v774_v46 }
  0x62   :  { %398 = vmatpush.xpose.msrb.mxu0 %v786_v53  ;;  %453 = vmatpush.xpose.msrb.mxu1 %v732_v20  ;;  %v56_v20 = vld [vmem:[%s983_s3 + $0x8] sm:$0xff]  ;;  %s569_s3 = sld [smem:[#allocation2 + $0x1]] }
  0x63   :  { %593 = vmatpush.xpose.msrb.mxu3 %v757_v35 }
  0x64   :  { %577 = vmatpush.xpose.msrb.mxu2 %v786_v53 }
  0x66   :  { %402 = vmatpush.xpose.msrb.mxu0 %v793_v56  ;;  %455 = vmatpush.xpose.msrb.mxu1 %v745_v28 }
  0x67   :  { %594 = vmatpush.xpose.msrb.mxu3 %v769_v42  ;;  %494 = vperm.xlu0 %608, %v56_v20  }
  0x68   :  { %578 = vmatpush.xpose.msrb.mxu2 %v793_v56 }
  0x6a   :  { %406 = vmatpush.xpose.msrb.mxu0 %v810_v3  ;;  %457 = vmatpush.xpose.msrb.mxu1 %v757_v35 }
  0x6b   :  { %595 = vmatpush.xpose.msrb.mxu3 %v784_v52 }
  0x6c   :  { %579 = vmatpush.xpose.msrb.mxu2 %v810_v3 }
  0x6e   :  { %410 = vmatpush.xpose.msrb.mxu0 %v822_v14  ;;  %459 = vmatpush.xpose.msrb.mxu1 %v769_v42 }
  0x6f   :  { %596 = vmatpush.xpose.msrb.mxu3 %v799_v61 }
  0x70   :  { %580 = vmatpush.xpose.msrb.mxu2 %v822_v14 }
  0x72   :  { %414 = vmatpush.xpose.msrb.mxu0 %v834_v24  ;;  %461 = vmatpush.xpose.msrb.mxu1 %v784_v52 }
  0x73   :  { %597 = vmatpush.xpose.msrb.mxu3 %v806_v0 }
  0x74   :  { %581 = vmatpush.xpose.msrb.mxu2 %v834_v24 }
  0x76   :  { %418 = vmatpush.xpose.msrb.mxu0 %v841_v29  ;;  %463 = vmatpush.xpose.msrb.mxu1 %v799_v61 }
  0x77   :  { %598 = vmatpush.xpose.msrb.mxu3 %v817_v6 }
  0x78   :  { %582 = vmatpush.xpose.msrb.mxu2 %v841_v29 }
  0x7a   :  { %422 = vmatpush.xpose.msrb.mxu0 %v858_v44  ;;  %465 = vmatpush.xpose.msrb.mxu1 %v806_v0 }
  0x7b   :  { %599 = vmatpush.xpose.msrb.mxu3 %v832_v23 }
  0x7c   :  { %583 = vmatpush.xpose.msrb.mxu2 %v858_v44  ;;  %v506_v44 = vstv %s569_s3 }
  0x7e   :  { %426 = vmatpush.xpose.msrb.mxu0 %v867_v51  ;;  %467 = vmatpush.xpose.msrb.mxu1 %v817_v6 }
  0x7f   :  { %600 = vmatpush.xpose.msrb.mxu3 %v846_v34 }
  0x80   :  { %584 = vmatpush.xpose.msrb.mxu2 %v867_v51  ;;  %v527_v51 = vshrl.u32 %v526_v45, 7 }
  0x82   :  { %430 = vmatpush.xpose.msrb.mxu0 %v873_v58  ;;  %469 = vmatpush.xpose.msrb.mxu1 %v832_v23  ;;  %v528_v59 = vadd.s32 8, %v527_v51  ;;  %vm536_vm1 = vcmp.eq.s32.totalorder %v527_v51, %v533_v57 }
  0x83   :  { %601 = vmatpush.xpose.msrb.mxu3 %v856_v43  ;;  %v539_v1 = vsel %vm536_vm1, %v538_v60, 0.0 }
  0x84   :  { %585 = vmatpush.xpose.msrb.mxu2 %v873_v58  ;;  %vm537_vm2 = vcmp.eq.s32.totalorder %v528_v59, %v533_v57 }
  0x85   :  { %v540_v5 = vsel %vm537_vm2, %v538_v60, 0.0 }
  0x86   :  { %434 = vmatpush.xpose.msrb.mxu0 %v878_v62  ;;  %471 = vmatpush.xpose.msrb.mxu1 %v846_v34  ;;  %v609_v34 = vld [vmem:[%s984_s4] ss:$0 sm:$0xff]  ;;  %s656_s4 = smov [#allocation5]  }
  0x87   :  { %602 = vmatpush.xpose.msrb.mxu3 %v865_v50  ;;  %s554_s12 = sshll.u32 %s656_s4, 4  ;;  %s555_s12 = int_to_ptr.vmem [resolvable:$true] %s554_s12 }
  0x88   :  { %586 = vmatpush.xpose.msrb.mxu2 %v878_v62  ;;  %v513_v62 = vstv %s34_s11 }
  0x89   :  { %436 = vmatmul.f32.vlgmr.msrb.gmra.mxu0 %v893_v7 }
  0x8a   :  { %473 = vmatpush.xpose.msrb.mxu1 %v856_v43  ;;  %481 = vmatmul.f32.vlgmr.msrb.gmra.mxu3 %v909_v16 }
  0x8b   :  { %440 = vmatmul.f32.vlgmr.msrb.gmra.mxu2 %v909_v16 }
  0x8e   :  { %475 = vmatpush.xpose.msrb.mxu1 %v865_v50 }
  0x91   :  { %477 = vmatmul.f32.vlgmr.msrb.gmra.mxu1 %v893_v7 }
  0xce   :  { %v260_v35 = vpop.f32.mrf.mxu1  ;;  %v318_v42 = vpop.f32.mrf.mxu2 }
  0xd0   :  { %v151_v28 = vpop.f32.mrf.mxu0 }
  0xd1   :  { %v261_v53 = vadd.f32 %v260_v35, %v151_v28  ;;  %v490_v14 = vpop.permute.xlu0 %489 }
  0xd3   :  { %v362_v40 = vpop.f32.mrf.mxu3  ;;  %v319_v3 = vadd.f32 %v318_v42, %v261_v53 }
  0xd5   :  { %v363_v22 = vadd.f32 %v362_v40, %v319_v3 }
  0xd6   :  { %v264_v52 = vpop.f32.mrf.mxu1 }
  0xd9   :  { %v495_v39 = vpop.permute.xlu0 %494 }
  0xda   :  { %v159_v46 = vpop.f32.mrf.mxu0  ;;  %v323_v61 = vpop.f32.mrf.mxu2 }
  0xdb   :  { %v265_v0 = vadd.f32 %v264_v52, %v159_v46 }
  0xdc   :  { %v368_v56 = vpop.f32.mrf.mxu3 }
  0xdd   :  { %v324_v6 = vadd.f32 %v323_v61, %v265_v0 }
  0xdf   :  { %v369_v24 = vadd.f32 %v368_v56, %v324_v6 }
 0x106   :  { %v437_v21 = vpop.f32.mrf.mxu0 }
 0x107   :  { %v438_v23 = vadd.f32 %v437_v21, %v363_v22 }
 0x10d   :  { %v482_v26 = vpop.f32.mrf.mxu3 }
 0x10e   :  { %v441_v27 = vpop.f32.mrf.mxu2  ;;  %v478_v29 = vpop.f32.mrf.mxu1 }
 0x10f   :  { %v442_v30 = vadd.f32 %v441_v27, %v369_v24  ;;  %v479_v31 = vadd.f32 %v478_v29, %v438_v23 }
 0x111   :  { %v485_v32 = vmul.f32 2.0, %v479_v31  ;;  %v483_v36 = vadd.f32 %v482_v26, %v442_v30 }
 0x113   :  { %v497_v37 = vsub.f32 %v490_v14, %v485_v32  ;;  %v486_v38 = vmul.f32 2.0, %v483_v36 }
 0x115   :  { %v502_v41 = vadd.f32 %v609_v34, %v497_v37  ;;  %v498_v43 = vsub.f32 %v495_v39, %v486_v38 }
 0x117   :  { %v504_v47 = vmax.f32 %v502_v41, 0.0  ;;  %v503_v48 = vadd.f32 %v609_v34, %v498_v43 }
 0x119   :  { %v507_v49 = vmul.f32 %v506_v44, %v504_v47  ;;  %v505_v50 = vmax.f32 %v503_v48, 0.0 }
 0x11b   :  { %v509_v54 = vmul.f32 1.442695, %v507_v49  ;;  %v508_v55 = vmul.f32 %v506_v44, %v505_v50 }
 0x11d   :  { %610 = vpow2.f32 %v509_v54  ;;  %v511_v58 = vmul.f32 1.442695, %v508_v55 }
 0x11f   :  { %612 = vpow2.f32 %v511_v58 }
 0x123   :  { %v611_v63 = vpop.eup %610 }
 0x124   :  { %v514_v2 = vmul.f32 %v611_v63, %v513_v62 }
 0x125   :  { %v613_v4 = vpop.eup %612 }
 0x126   :  { %v515_v7 = vmul.f32 %v613_v4, %v513_v62  ;;  %v541_v11 = vadd.f32 %v539_v1, %v514_v2 }
 0x128   :  { %v542_v18 = vadd.f32 %v540_v5, %v515_v7  ;;  %543 = vst [vmem:[#allocation5] sm:$0xff] %v541_v11 }
 0x12a   :  { %544 = vst [vmem:[#allocation5 + $0x8] sm:$0xff] %v542_v18 }
 0x12b   :  { %562 = dma.vmem_to_hbm [thread:$0]  %s555_s12, 256, %s557_s15, [#allocation3], %s657_s16, %s657_s16, %s658_s17  }
 0x12c   :  { %652 = dma.done.wait [#allocation3], 256  }
 0x12d   :  { %653 = vsyncadd [#allocation3], 4294967040 }
 0x12e   :  { %567 = vsyncpa [#allocation3], 1 }
 0x12f   :  { %568 = vsyncpa [#allocation4], 1 }

</bundles_post_ra>
